<compile_context>
chip_gen: v7x
topology: tpu7x:2x2x1
jax: 0.10.0
libtpu: 0.0.40
codegen_flags: <defaults>
</compile_context>

<pallas_src>
import functools
from typing import NamedTuple

import jax
import jax.numpy as jnp
from jax import lax
from jax.experimental import pallas as pl
from jax.experimental.pallas import tpu as pltpu


def _round_up(x, m):
    return (x + m - 1) // m * m


def _cdiv(a, b):
    return (a + b - 1) // b


def solver_fwd_kernel(x_ref, w_ref, b_ref, scores_ref, preds_ref, acc_ref, *,
                      num_classes):
    k = pl.program_id(1)

    @pl.when(k == 0)
    def _init():
        acc_ref[...] = jnp.zeros_like(acc_ref)

    # f32 -> bf16 cast of the x tile happens in VMEM (cheap VPU op hidden under
    # the MXU / DMA); x HBM traffic stays at one 4 B/elem read, no wrapper copy.
    acc_ref[...] += jnp.dot(x_ref[...].astype(jnp.bfloat16), w_ref[...],
                            preferred_element_type=jnp.float32)

    @pl.when(k == pl.num_programs(1) - 1)
    def _finalize():
        scores = acc_ref[...] + b_ref[...]
        scores_ref[...] = scores
        # In-kernel first-max argmax over the class (lane) dim.  Padded class
        # lanes hold exactly 0.0 (zero W/b columns) so they MUST be masked out
        # before taking the max.
        kpad = scores.shape[-1]
        col = lax.broadcasted_iota(jnp.int32, scores.shape, 1)
        masked = jnp.where(col < num_classes, scores, -jnp.inf)
        row_max = jnp.max(masked, axis=-1, keepdims=True)
        first_idx = jnp.min(jnp.where(masked == row_max, col, kpad),
                            axis=-1, keepdims=True)
        preds_ref[...] = first_idx.astype(jnp.int32)


class SolverParams(NamedTuple):
    w_pad: jax.Array      # (D_pad, KPAD) bf16, zero-padded
    b_pad: jax.Array      # (1, KPAD) f32, zero-padded
    num_classes: int
    feat_dim: int
    feat_dim_pad: int
    td: int               # contraction tile size


def prepare_solver_params(w, b, *, td_max=4096):
    """Pad / cast the classifier weights ONCE (hoisted out of the per-batch
    solve loop used by generative replay)."""
    D, K = w.shape
    KPAD = _round_up(K, 128)              # lane-dense class dim; keep at 128
    # Contraction tiling: keeps the batch tile large (and VMEM bounded) even
    # for big feature dims; tile count chosen to minimize D padding.
    n_k = _cdiv(D, td_max)
    TD = D if n_k == 1 else _round_up(_cdiv(D, n_k), 128)
    D_pad = _round_up(D, TD)
    w_pad = jnp.pad(w, ((0, D_pad - D), (0, KPAD - K))).astype(jnp.bfloat16)
    b_pad = jnp.pad(b.reshape(1, K).astype(jnp.float32), ((0, 0), (0, KPAD - K)))
    return SolverParams(w_pad, b_pad, int(K), int(D), int(D_pad), int(TD))


def _vmem_capacity_bytes():
    try:
        return int(pltpu.get_tpu_info().vmem_capacity_bytes)
    except Exception:
        return 64 << 20   # conservative fallback (v7x per-TensorCore VMEM)


def _pick_batch_tile(B, td, kpad, budget):
    # Per-row VMEM cost: double-buffered f32 x tile, f32 scores out, int32
    # preds out (lane-padded to 128), plus the f32 accumulator scratch.
    per_row = 2 * td * 4 + 2 * kpad * 4 + 2 * 128 * 4 + kpad * 4
    fixed = 2 * td * kpad * 2 + 2 * 8 * kpad * 4      # W (bf16) + bias buffers
    tb_cap = (budget - fixed) // per_row
    tb_cap = max(8, min(1024, (tb_cap // 8) * 8))     # >1024 rows: diminishing
    n_tiles = _cdiv(B, tb_cap)
    if B >= 64 and n_tiles == 1:
        n_tiles = 2            # >=2 batch tiles so v7x's 2 TensorCores both work
    tb = _round_up(_cdiv(B, n_tiles), 8)              # minimal batch padding
    return tb


def solver_solve(x, params: SolverParams):
    """Concrete Solver forward() + solve(): returns (scores[B, K], preds[B])."""
    B = x.shape[0]
    D = 1
    for d in x.shape[1:]:
        D *= d
    assert D == params.feat_dim

    K = params.num_classes
    KPAD = params.w_pad.shape[1]
    TD, D_pad = params.td, params.feat_dim_pad

    vmem_cap = _vmem_capacity_bytes()
    budget = min(vmem_cap // 2, 96 << 20)
    TB = _pick_batch_tile(B, TD, KPAD, budget)
    B_pad = _round_up(B, TB)

    x2d = x.reshape(B, D)          # stays f32: bf16 cast is fused in-kernel
    if B_pad != B or D_pad != D:
        x2d = jnp.pad(x2d, ((0, B_pad - B), (0, D_pad - D)))

    n_b, n_k = B_pad // TB, D_pad // TD

    # Approximate peak VMEM so the scoped default (16 MiB v5e / 32 MiB v6e,v7x)
    # never bites; clamp to physical capacity.
    vmem_needed = (2 * TB * TD * 4 + 2 * TD * KPAD * 2 + 2 * 8 * KPAD * 4
                   + 2 * TB * KPAD * 4 + 2 * TB * 128 * 4 + TB * KPAD * 4)
    vmem_limit = int(min(vmem_cap, max(32 << 20, vmem_needed + (8 << 20))))

    scores_pad, preds_pad = pl.pallas_call(
        functools.partial(solver_fwd_kernel, num_classes=K),
        out_shape=(
            jax.ShapeDtypeStruct((B_pad, KPAD), jnp.float32),
            jax.ShapeDtypeStruct((B_pad, 1), jnp.int32),
        ),
        grid=(n_b, n_k),
        in_specs=[
            # x: one (TB, TD) f32 tile per step -> auto double-buffered DMA
            # overlaps the HBM read of the next tile with this tile's matmul.
            pl.BlockSpec((TB, TD), lambda i, k: (i, k)),
            # W: indexed only by k -> resident across batch tiles.
            pl.BlockSpec((TD, KPAD), lambda i, k: (k, 0)),
            # bias: fully resident.
            pl.BlockSpec((1, KPAD), lambda i, k: (0, 0)),
        ],
        out_specs=(
            pl.BlockSpec((TB, KPAD), lambda i, k: (i, 0)),
            pl.BlockSpec((TB, 1), lambda i, k: (i, 0)),
        ),
        scratch_shapes=[pltpu.VMEM((TB, KPAD), jnp.float32)],
        compiler_params=pltpu.CompilerParams(
            # Batch tiles independent -> shard across cores; D is a reduction.
            dimension_semantics=("parallel", "arbitrary"),
            vmem_limit_bytes=vmem_limit,
        ),
    )(x2d, params.w_pad, params.b_pad)

    return scores_pad[:B, :K], preds_pad[:B, 0]


if __name__ == "__main__":
    # Small shapes consistent with the module's image-classifier usage.
    B, C, H, W = 2, 4, 16, 16
    NUM_CLASSES = 10
    D = C * H * W

    key = jax.random.PRNGKey(0)
    kx, kw, kb = jax.random.split(key, 3)

    x = jax.random.normal(kx, (B, C, H, W), dtype=jnp.float32)
    w = jax.random.normal(kw, (D, NUM_CLASSES), dtype=jnp.float32) * 0.02
    b = jax.random.normal(kb, (NUM_CLASSES,), dtype=jnp.float32) * 0.01

    params = prepare_solver_params(w, b)          # hoisted: pad/cast W, b once
    scores, preds = solver_solve(x, params)
    jax.block_until_ready((scores, preds))

    # Reference with the same bf16 input rounding as the kernel (f32 accumulate).
    x2d = x.reshape(B, D)
    ref_scores = (
        x2d.astype(jnp.bfloat16).astype(jnp.float32)
        @ w.astype(jnp.bfloat16).astype(jnp.float32)
    ) + b
    ref_preds = jnp.argmax(ref_scores, axis=1).astype(jnp.int32)

    assert scores.shape == (B, NUM_CLASSES)
    assert preds.shape == (B,)
    assert jnp.allclose(scores, ref_scores, atol=2e-2, rtol=2e-2)
    assert jnp.array_equal(preds, ref_preds)

    print("KERNEL_OK")
</pallas_src>

<mosaic_0001>
module attributes {stable_mosaic.version = 11 : i64} {
  func.func @solver_fwd_kernel(%arg0: i32, %arg1: i32, %arg2: memref<8x1024xf32, #tpu.memory_space<vmem>>, %arg3: memref<1024x128xbf16, #tpu.memory_space<vmem>>, %arg4: memref<1x128xf32, #tpu.memory_space<vmem>>, %arg5: memref<8x128xf32, #tpu.memory_space<vmem>>, %arg6: memref<8x1xi32, #tpu.memory_space<vmem>>, %arg7: memref<8x128xf32, #tpu.memory_space<vmem>>) attributes {dimension_semantics = [#tpu.dimension_semantics<parallel>, #tpu.dimension_semantics<arbitrary>], iteration_bounds = array<i64: 1, 1>, scalar_prefetch = 0 : i64, scratch_operands = 1 : i64, tpu.core_type = #tpu.core_type<tc>, window_params = [{transform_indices = @transform_0, window_bounds = array<i64: 8, 1024>}, {transform_indices = @transform_1, window_bounds = array<i64: 1024, 128>}, {pipeline_mode = #tpu.pipeline_mode<synchronous>, transform_indices = @transform_2, window_bounds = array<i64: 1, 128>}, {transform_indices = @transform_3, window_bounds = array<i64: 8, 128>}, {transform_indices = @transform_4, window_bounds = array<i64: 8, 1>}]} {
    %c0_i32 = arith.constant 0 : i32
    %0 = arith.cmpi eq, %arg1, %c0_i32 : i32
    %1 = arith.extui %0 : i1 to i32
    %c0_i32_0 = arith.constant 0 : i32
    %2 = arith.cmpi ne, %1, %c0_i32_0 : i32
    scf.if %2 {
      %cst_10 = arith.constant 0.000000e+00 : f32
      %13 = vector.broadcast %cst_10 : f32 to vector<8x128xf32>
      %c0_11 = arith.constant 0 : index
      %c0_12 = arith.constant 0 : index
      %14 = vector.load %arg7[%c0_11, %c0_12] : memref<8x128xf32, #tpu.memory_space<vmem>>, vector<8x128xf32>
      tpu.vector_store %arg7[%c0_11, %c0_12], %13 {strides = array<i32>} : memref<8x128xf32, #tpu.memory_space<vmem>>, vector<8x128xf32>,
    } else {
    }
    %c0 = arith.constant 0 : index
    %c0_1 = arith.constant 0 : index
    %3 = vector.load %arg7[%c0, %c0_1] : memref<8x128xf32, #tpu.memory_space<vmem>>, vector<8x128xf32>
    %c0_2 = arith.constant 0 : index
    %c0_3 = arith.constant 0 : index
    %4 = vector.load %arg2[%c0_2, %c0_3] : memref<8x1024xf32, #tpu.memory_space<vmem>>, vector<8x1024xf32>
    %5 = arith.truncf %4 : vector<8x1024xf32> to vector<8x1024xbf16>
    %c0_4 = arith.constant 0 : index
    %c0_5 = arith.constant 0 : index
    %6 = vector.load %arg3[%c0_4, %c0_5] : memref<1024x128xbf16, #tpu.memory_space<vmem>>, vector<1024x128xbf16>
    %cst = arith.constant dense<0.000000e+00> : vector<8x128xf32>
    %7 = tpu.matmul %5, %6, %cst {dimension_numbers = #tpu.dot_dimension_numbers<[1], [0], [0], [1], [0, 0, 1, 1], [], []>} : vector<8x1024xbf16>, vector<1024x128xbf16>, vector<8x128xf32> -> vector<8x128xf32>
    %8 = arith.addf %3, %7 : vector<8x128xf32>
    %c0_6 = arith.constant 0 : index
    %c0_7 = arith.constant 0 : index
    %9 = vector.load %arg7[%c0_6, %c0_7] : memref<8x128xf32, #tpu.memory_space<vmem>>, vector<8x128xf32>
    tpu.vector_store %arg7[%c0_6, %c0_7], %8 {strides = array<i32>} : memref<8x128xf32, #tpu.memory_space<vmem>>, vector<8x128xf32>,
    %c0_i32_8 = arith.constant 0 : i32
    %10 = arith.cmpi eq, %arg1, %c0_i32_8 : i32
    %11 = arith.extui %10 : i1 to i32
    %c0_i32_9 = arith.constant 0 : i32
    %12 = arith.cmpi ne, %11, %c0_i32_9 : i32
    scf.if %12 {
      %c0_10 = arith.constant 0 : index
      %c0_11 = arith.constant 0 : index
      %13 = vector.load %arg7[%c0_10, %c0_11] : memref<8x128xf32, #tpu.memory_space<vmem>>, vector<8x128xf32>
      %c0_12 = arith.constant 0 : index
      %c0_13 = arith.constant 0 : index
      %14 = vector.load %arg4[%c0_12, %c0_13] : memref<1x128xf32, #tpu.memory_space<vmem>>, vector<1x128xf32>
      %15 = vector.broadcast %14 : vector<1x128xf32> to vector<8x128xf32>
      %16 = arith.addf %13, %15 : vector<8x128xf32>
      %c0_14 = arith.constant 0 : index
      %c0_15 = arith.constant 0 : index
      %17 = vector.load %arg5[%c0_14, %c0_15] : memref<8x128xf32, #tpu.memory_space<vmem>>, vector<8x128xf32>
      tpu.vector_store %arg5[%c0_14, %c0_15], %16 {strides = array<i32>} : memref<8x128xf32, #tpu.memory_space<vmem>>, vector<8x128xf32>,
      %18 = tpu.iota {dimensions = array<i32: 1>} : vector<8x128xi32>
      %c10_i32 = arith.constant 10 : i32
      %19 = vector.broadcast %c10_i32 : i32 to vector<8x128xi32>
      %20 = arith.cmpi slt, %18, %19 : vector<8x128xi32>
      %cst_16 = arith.constant 0xFF800000 : f32
      %21 = vector.broadcast %cst_16 : f32 to vector<8x128xf32>
      %22 = arith.select %20, %16, %21 : vector<8x128xi1>, vector<8x128xf32>
      %cst_17 = arith.constant dense<0xFF800000> : vector<8xf32>
      %23 = vector.multi_reduction <maximumf>, %22, %cst_17 [1] : vector<8x128xf32> to vector<8xf32>
      %24 = vector.shape_cast %23 : vector<8xf32> to vector<8x1xf32>
      %25 = vector.broadcast %24 : vector<8x1xf32> to vector<8x128xf32>
      %26 = arith.cmpf oeq, %22, %25 : vector<8x128xf32>
      %c128_i32 = arith.constant 128 : i32
      %27 = vector.broadcast %c128_i32 : i32 to vector<8x128xi32>
      %28 = arith.select %26, %18, %27 : vector<8x128xi1>, vector<8x128xi32>
      %cst_18 = arith.constant dense<2147483647> : vector<8xi32>
      %29 = vector.multi_reduction <minsi>, %28, %cst_18 [1] : vector<8x128xi32> to vector<8xi32>
      %30 = vector.shape_cast %29 : vector<8xi32> to vector<8x1xi32>
      %c0_19 = arith.constant 0 : index
      %c0_20 = arith.constant 0 : index
      %31 = vector.load %arg6[%c0_19, %c0_20] : memref<8x1xi32, #tpu.memory_space<vmem>>, vector<8x1xi32>
      tpu.vector_store %arg6[%c0_19, %c0_20], %30 {strides = array<i32>} : memref<8x1xi32, #tpu.memory_space<vmem>>, vector<8x1xi32>,
    } else {
    }
    return
  }
  func.func @transform_0(%arg0: i32, %arg1: i32) -> (i32, i32) {
    %c0_i32 = arith.constant 0 : i32
    return %arg0, %arg1 : i32, i32
  }
  func.func @transform_1(%arg0: i32, %arg1: i32) -> (i32, i32) {
    %c0_i32 = arith.constant 0 : i32
    %c0_i32_0 = arith.constant 0 : i32
    return %arg1, %c0_i32 : i32, i32
  }
  func.func @transform_2(%arg0: i32, %arg1: i32) -> (i32, i32) {
    %c0_i32 = arith.constant 0 : i32
    %c0_i32_0 = arith.constant 0 : i32
    %c0_i32_1 = arith.constant 0 : i32
    return %c0_i32, %c0_i32_0 : i32, i32
  }
  func.func @transform_3(%arg0: i32, %arg1: i32) -> (i32, i32) {
    %c0_i32 = arith.constant 0 : i32
    %c0_i32_0 = arith.constant 0 : i32
    return %arg0, %c0_i32 : i32, i32
  }
  func.func @transform_4(%arg0: i32, %arg1: i32) -> (i32, i32) {
    %c0_i32 = arith.constant 0 : i32
    %c0_i32_0 = arith.constant 0 : i32
    return %arg0, %c0_i32 : i32, i32
  }
}

</mosaic_0001>

<bundles_post_ra>
// kernel: tpu_custom_call.1
= control target key start
LH: loop header
LB: loop body
LE: loop exit
PB: predicated region body
PF: predicated region fallthrough
CT: control target
= control target key end

     0   :  { %10 = vsyncpa [#allocation4], 0  ;;  %s1170_s0 = inlined_call_operand.hbm [shape: f32[8,1024], index: 0, kind: input, shape index: {}]   ;;  %s1171_s1 = inlined_call_operand.hbm [shape: bf16[1024,128], index: 1, kind: input, shape index: {}]   ;;  %s1172_s2 = inlined_call_operand.vmem [shape: f32[1,128], index: 2, kind: input, shape index: {}]   ;;  %s1173_s3 = inlined_call_operand.hbm [shape: f32[8,128], index: 3, kind: output, shape index: {0}]   ;;  %s1174_s4 = inlined_call_operand.vmem [shape: s32[8,1], index: 4, kind: output, shape index: {1}]  }
   0x1   :  { %11 = vsyncpa [#allocation7], 0 }
   0x2   :  { %12 = vsyncpa [#allocation5], 0  ;;  %s1091_s15 = smov [#allocation3]   ;;  %s1092_s17 = smov [#allocation6]  }
   0x3   :  { %s19_s16 = sshll.u32 %s1091_s15, 4  ;;  %s28_s18 = sshll.u32 %s1092_s17, 4  ;;  %s20_s16 = int_to_ptr.vmem [resolvable:$true] %s19_s16  ;;  %s1121_s18 = int_to_ptr.vmem [resolvable:$true] %s28_s18 }
   0x4   :  { %s1019_s21 = scalar_lea.hbm %s1170_s0, 1024 }
   0x5   :  { %p1020_p0 = scmp.ne.s32.totalorder %s1170_s0, %s1019_s21  ;;  %p1023_p1 = scmp.lt.u32.totalorder %s1019_s21, %s1170_s0 }
   0x7   :  { %p1025_p2 = pnand %p1023_p1, %p1020_p0 }
   0x9   :  { %1028 = shalt.err (!%p1025_p2)
}
   0xa   :  { %s1029_s26 = scalar_lea.vmem %s20_s16, 1024  ;;  %p1034_p4 = scmp.lt.s32.totalorder %s20_s16, %s20_s16 }
   0xb   :  { %p1030_p3 = scmp.ne.s32.totalorder %s20_s16, %s1029_s26  ;;  %p1035_p5 = scmp.lt.s32.totalorder %s1029_s26, %s1029_s26 }
   0xd   :  { %p1036_p6 = por %p1035_p5, %p1034_p4 }
   0xf   :  { %p1037_p7 = pnand %p1036_p6, %p1030_p3 }
  0x11   :  { %1040 = shalt.err (!%p1037_p7)
}
  0x12   :  { %22 = dma.hbm_to_vmem [thread:$0]  %s1170_s0, 1024, %s20_s16, [#allocation4]  }
  0x13   :  { %s1041_s5 = scalar_lea.hbm %s1171_s1, 8192 }
  0x14   :  { %p1042_p8 = scmp.ne.s32.totalorder %s1171_s1, %s1041_s5  ;;  %p1045_p9 = scmp.lt.u32.totalorder %s1041_s5, %s1171_s1 }
  0x16   :  { %p1047_p10 = pnand %p1045_p9, %p1042_p8 }
  0x18   :  { %1050 = shalt.err (!%p1047_p10)
}
  0x19   :  { %s1051_s10 = scalar_lea.vmem %s1121_s18, 8192  ;;  %p1056_p12 = scmp.lt.s32.totalorder %s1121_s18, %s1121_s18 }
  0x1a   :  { %p1052_p11 = scmp.ne.s32.totalorder %s1121_s18, %s1051_s10  ;;  %p1057_p13 = scmp.lt.s32.totalorder %s1051_s10, %s1051_s10 }
  0x1c   :  { %p1058_p0 = por %p1057_p13, %p1056_p12 }
  0x1e   :  { %p1059_p1 = pnand %p1058_p0, %p1052_p11 }
  0x20   :  { %1062 = shalt.err (!%p1059_p1)
}
  0x21   :  { %s1093_s0 = smov 64   ;;  %s1094_s11 = smov 4  }
  0x22   :  { %34 = dma.hbm_to_vmem [thread:$0]  %s1171_s1, 8192, %s1121_s18, [#allocation7], %s1093_s0, %s1093_s0, %s1094_s11  }
  0x23   :  { %1085 = dma.done.wait [#allocation4], 1024  }
  0x24   :  { %1086 = vsyncadd [#allocation4], 4294966272 }
  0x25   :  { %1087 = dma.done.wait [#allocation7], 8192  }
  0x26   :  { %1088 = vsyncadd [#allocation7], 4294959104  ;;  %v955_v0 = vld [vmem:[#allocation6 + $0x40] sm:$0xff]   ;;  %v959_v4 = vld [vmem:[#allocation6 + $0x48] sm:$0xff]   ;;  %s1095_s15 = smov [#allocation8]  }
  0x27   :  { %v956_v1 = vld [vmem:[#allocation6 + $0xc0] sm:$0xff]   ;;  %862 = vmatprep.subr.bf16.mxu0 %v955_v0  ;;  %v960_v5 = vld [vmem:[#allocation6 + $0xc8] sm:$0xff]   ;;  %v963_v8 = vld [vmem:[#allocation6 + $0x50] sm:$0xff]  }
  0x28   :  { %v957_v2 = vld [vmem:[#allocation6] sm:$0xff]   ;;  %884 = vmatprep.subr.bf16.mxu1 %v956_v1  ;;  %v961_v6 = vld [vmem:[#allocation6 + $0x8] sm:$0xff]   ;;  %v964_v9 = vld [vmem:[#allocation6 + $0xd0] sm:$0xff]  }
  0x29   :  { %v958_v3 = vld [vmem:[#allocation6 + $0x80] sm:$0xff]   ;;  %863 = vmatpush3.bf16.msra.mxu0 %v957_v2  ;;  %v962_v7 = vld [vmem:[#allocation6 + $0x88] sm:$0xff]   ;;  %v965_v10 = vld [vmem:[#allocation6 + $0x10] sm:$0xff]  }
  0x2a   :  { %885 = vmatpush3.bf16.msra.mxu1 %v958_v3  ;;  %864 = vmatprep.subr.bf16.mxu0 %v959_v4  ;;  %v966_v11 = vld [vmem:[#allocation6 + $0x90] sm:$0xff]   ;;  %v967_v12 = vld [vmem:[#allocation6 + $0x58] sm:$0xff]   ;;  %v971_v16 = vld [vmem:[#allocation6 + $0x60] sm:$0xff]  }
  0x2b   :  { %886 = vmatprep.subr.bf16.mxu1 %v960_v5  ;;  %v968_v13 = vld [vmem:[#allocation6 + $0xd8] sm:$0xff]   ;;  %v972_v17 = vld [vmem:[#allocation6 + $0xe0] sm:$0xff]   ;;  %v975_v20 = vld [vmem:[#allocation6 + $0x68] sm:$0xff]  }
  0x2c   :  { %v969_v14 = vld [vmem:[#allocation6 + $0x18] sm:$0xff]   ;;  %v973_v18 = vld [vmem:[#allocation6 + $0x20] sm:$0xff]   ;;  %v976_v21 = vld [vmem:[#allocation6 + $0xe8] sm:$0xff]  }
  0x2d   :  { %865 = vmatpush3.bf16.msra.mxu0 %v961_v6  ;;  %v970_v15 = vld [vmem:[#allocation6 + $0x98] sm:$0xff]   ;;  %v974_v19 = vld [vmem:[#allocation6 + $0xa0] sm:$0xff]   ;;  %v977_v22 = vld [vmem:[#allocation6 + $0x28] sm:$0xff]  }
  0x2e   :  { %887 = vmatpush3.bf16.msra.mxu1 %v962_v7  ;;  %866 = vmatprep.subr.bf16.mxu0 %v963_v8  ;;  %v978_v23 = vld [vmem:[#allocation6 + $0xa8] sm:$0xff]   ;;  %v979_v24 = vld [vmem:[#allocation6 + $0x70] sm:$0xff]   ;;  %v983_v28 = vld [vmem:[#allocation6 + $0x78] sm:$0xff]  }
  0x2f   :  { %888 = vmatprep.subr.bf16.mxu1 %v964_v9  ;;  %v980_v25 = vld [vmem:[#allocation6 + $0xf0] sm:$0xff]   ;;  %v984_v29 = vld [vmem:[#allocation6 + $0xf8] sm:$0xff]   ;;  %v51_v32 = vld [vmem:[#allocation3 + $0x8] sm:$0xff] }
  0x30   :  { %v981_v26 = vld [vmem:[#allocation6 + $0x30] sm:$0xff]   ;;  %v985_v30 = vld [vmem:[#allocation6 + $0x38] sm:$0xff]   ;;  %v50_v34 = vld [vmem:[#allocation3] sm:$0xff]  ;;  %v59_v35 = vpack.c.bf16 %v51_v32, %v51_v32 }
  0x31   :  { %867 = vmatpush3.bf16.msra.mxu0 %v965_v10  ;;  %v982_v27 = vld [vmem:[#allocation6 + $0xb0] sm:$0xff]   ;;  %v986_v31 = vld [vmem:[#allocation6 + $0xb8] sm:$0xff]   ;;  %v58_v37 = vpack.c.bf16 %v50_v34, %v50_v34  ;;  %v987_v40 = vld [vmem:[#allocation6 + $0x140] sm:$0xff]  }
  0x32   :  { %889 = vmatpush3.bf16.msra.mxu1 %v966_v11  ;;  %868 = vmatprep.subr.bf16.mxu0 %v967_v12  ;;  %v53_v33 = vld [vmem:[#allocation3 + $0x18] sm:$0xff]  ;;  %v52_v38 = vld [vmem:[#allocation3 + $0x10] sm:$0xff]  ;;  %v988_v41 = vld [vmem:[#allocation6 + $0x1c0] sm:$0xff]  }
  0x33   :  { %890 = vmatprep.subr.bf16.mxu1 %v968_v13  ;;  %v61_v36 = vpack.c.bf16 %v53_v33, %v53_v33  ;;  %v60_v39 = vpack.c.bf16 %v52_v38, %v52_v38  ;;  %610 = vmatprep.mubr.bf16.mxu0 %v59_v35  ;;  %v989_v42 = vld [vmem:[#allocation6 + $0x100] sm:$0xff]   ;;  %v991_v44 = vld [vmem:[#allocation6 + $0x148] sm:$0xff]   ;;  %v995_v48 = vld [vmem:[#allocation6 + $0x150] sm:$0xff]  }
  0x34   :  { %v990_v43 = vld [vmem:[#allocation6 + $0x180] sm:$0xff]   ;;  %v992_v45 = vld [vmem:[#allocation6 + $0x1c8] sm:$0xff]   ;;  %v996_v49 = vld [vmem:[#allocation6 + $0x1d0] sm:$0xff]  }
  0x35   :  { %869 = vmatpush3.bf16.msra.mxu0 %v969_v14  ;;  %650 = vmatprep.mubr.bf16.mxu1 %v61_v36  ;;  %v993_v46 = vld [vmem:[#allocation6 + $0x108] sm:$0xff]   ;;  %v997_v50 = vld [vmem:[#allocation6 + $0x110] sm:$0xff]   ;;  %v999_v52 = vld [vmem:[#allocation6 + $0x158] sm:$0xff]  }
  0x36   :  { %891 = vmatpush3.bf16.msra.mxu1 %v970_v15  ;;  %870 = vmatprep.subr.bf16.mxu0 %v971_v16  ;;  %v994_v47 = vld [vmem:[#allocation6 + $0x188] sm:$0xff]   ;;  %v998_v51 = vld [vmem:[#allocation6 + $0x190] sm:$0xff]   ;;  %v1000_v53 = vld [vmem:[#allocation6 + $0x1d8] sm:$0xff]  }
  0x37   :  { %892 = vmatprep.subr.bf16.mxu1 %v972_v17  ;;  %v1001_v54 = vld [vmem:[#allocation6 + $0x118] sm:$0xff]   ;;  %v1003_v56 = vld [vmem:[#allocation6 + $0x160] sm:$0xff]   ;;  %v1007_v60 = vld [vmem:[#allocation6 + $0x168] sm:$0xff]  }
  0x38   :  { %v1002_v55 = vld [vmem:[#allocation6 + $0x198] sm:$0xff]   ;;  %v1004_v57 = vld [vmem:[#allocation6 + $0x1e0] sm:$0xff]   ;;  %v1008_v61 = vld [vmem:[#allocation6 + $0x1e8] sm:$0xff]  }
  0x39   :  { %871 = vmatpush3.bf16.msra.mxu0 %v973_v18  ;;  %v1005_v58 = vld [vmem:[#allocation6 + $0x120] sm:$0xff]   ;;  %v1009_v62 = vld [vmem:[#allocation6 + $0x128] sm:$0xff]   ;;  %v1011_v0 = vld [vmem:[#allocation6 + $0x170] sm:$0xff]  }
  0x3a   :  { %893 = vmatpush3.bf16.msra.mxu1 %v974_v19  ;;  %872 = vmatprep.subr.bf16.mxu0 %v975_v20  ;;  %v1006_v59 = vld [vmem:[#allocation6 + $0x1a0] sm:$0xff]   ;;  %v1010_v63 = vld [vmem:[#allocation6 + $0x1a8] sm:$0xff]   ;;  %v1012_v1 = vld [vmem:[#allocation6 + $0x1f0] sm:$0xff]  }
  0x3b   :  { %894 = vmatprep.subr.bf16.mxu1 %v976_v21  ;;  %v1013_v2 = vld [vmem:[#allocation6 + $0x130] sm:$0xff]   ;;  %v1015_v4 = vld [vmem:[#allocation6 + $0x178] sm:$0xff]   ;;  %v55_v8 = vld [vmem:[#allocation3 + $0x28] sm:$0xff] }
  0x3c   :  { %v1014_v3 = vld [vmem:[#allocation6 + $0x1b0] sm:$0xff]   ;;  %v1016_v5 = vld [vmem:[#allocation6 + $0x1f8] sm:$0xff]   ;;  %v63_v10 = vpack.c.bf16 %v55_v8, %v55_v8  ;;  %v54_v12 = vld [vmem:[#allocation3 + $0x20] sm:$0xff] }
  0x3d   :  { %873 = vmatpush3.bf16.msra.mxu0 %v977_v22  ;;  %v1017_v6 = vld [vmem:[#allocation6 + $0x138] sm:$0xff]   ;;  %v56_v13 = vld [vmem:[#allocation3 + $0x30] sm:$0xff]  ;;  %v62_v14 = vpack.c.bf16 %v54_v12, %v54_v12 }
  0x3e   :  { %895 = vmatpush3.bf16.msra.mxu1 %v978_v23  ;;  %874 = vmatprep.subr.bf16.mxu0 %v979_v24  ;;  %v1018_v7 = vld [vmem:[#allocation6 + $0x1b8] sm:$0xff]   ;;  %v64_v15 = vpack.c.bf16 %v56_v13, %v56_v13 }
  0x3f   :  { %896 = vmatprep.subr.bf16.mxu1 %v980_v25  ;;  %v57_v9 = vld [vmem:[#allocation3 + $0x38] sm:$0xff] }
  0x40   :  { %v65_v11 = vpack.c.bf16 %v57_v9, %v57_v9 }
  0x41   :  { %875 = vmatpush3.bf16.msra.mxu0 %v981_v26 }
  0x42   :  { %897 = vmatpush3.bf16.msra.mxu1 %v982_v27  ;;  %876 = vmatprep.subr.bf16.mxu0 %v983_v28  ;;  %v753_v27 = vlaneseq }
  0x43   :  { %898 = vmatprep.subr.bf16.mxu1 %v984_v29 }
  0x45   :  { %877 = vmatpush3.bf16.msra.mxu0 %v985_v30 }
  0x46   :  { %899 = vmatpush3.bf16.msra.mxu1 %v986_v31  ;;  %906 = vmatprep.subr.bf16.mxu0 %v987_v40  ;;  %v861_v40 = vld [vmem:[%s1172_s2] ss:$0 sm:$0xff]  ;;  %s783_s2 = sshll.u32 %s1095_s15, 4  ;;  %s784_s2 = int_to_ptr.vmem [resolvable:$true] %s783_s2 }
  0x47   :  { %928 = vmatprep.subr.bf16.mxu1 %v988_v41  ;;  %s1063_s16 = scalar_lea.vmem %s784_s2, 128  ;;  %p1068_p3 = scmp.lt.s32.totalorder %s784_s2, %s784_s2 }
  0x48   :  { %611 = vmatmul.mubr.bf16.vlgmr.msra.gmra.mrb[0].mxu0 %v58_v37  ;;  %v754_v37 = vand.u32 127, %v753_v27  ;;  %p1064_p2 = scmp.ne.s32.totalorder %s784_s2, %s1063_s16  ;;  %p1069_p4 = scmp.lt.s32.totalorder %s1063_s16, %s1063_s16 }
  0x49   :  { %651 = vmatmul.mubr.bf16.vlgmr.msra.gmra.mrb[0].mxu1 %v60_v39  ;;  %907 = vmatpush3.bf16.msra.mxu0 %v989_v42 }
  0x4a   :  { %929 = vmatpush3.bf16.msra.mxu1 %v990_v43  ;;  %908 = vmatprep.subr.bf16.mxu0 %v991_v44  ;;  %vm755_vm0 = vcmp.lt.s32.totalorder %v754_v37, 10  ;;  %p1070_p5 = por %p1069_p4, %p1068_p3 }
  0x4b   :  { %930 = vmatprep.subr.bf16.mxu1 %v992_v45  ;;  %690 = vmatprep.mubr.bf16.mxu0 %v63_v10 }
  0x4c   :  { %730 = vmatprep.mubr.bf16.mxu1 %v65_v11  ;;  %p1071_p6 = pnand %p1070_p5, %p1064_p2 }
  0x4d   :  { %909 = vmatpush3.bf16.msra.mxu0 %v993_v46 }
  0x4e   :  { %931 = vmatpush3.bf16.msra.mxu1 %v994_v47  ;;  %910 = vmatprep.subr.bf16.mxu0 %v995_v48 }
  0x4f   :  { %932 = vmatprep.subr.bf16.mxu1 %v996_v49 }
  0x51   :  { %911 = vmatpush3.bf16.msra.mxu0 %v997_v50 }
  0x52   :  { %933 = vmatpush3.bf16.msra.mxu1 %v998_v51  ;;  %912 = vmatprep.subr.bf16.mxu0 %v999_v52 }
  0x53   :  { %934 = vmatprep.subr.bf16.mxu1 %v1000_v53 }
  0x55   :  { %913 = vmatpush3.bf16.msra.mxu0 %v1001_v54 }
  0x56   :  { %935 = vmatpush3.bf16.msra.mxu1 %v1002_v55  ;;  %914 = vmatprep.subr.bf16.mxu0 %v1003_v56 }
  0x57   :  { %936 = vmatprep.subr.bf16.mxu1 %v1004_v57 }
  0x59   :  { %915 = vmatpush3.bf16.msra.mxu0 %v1005_v58 }
  0x5a   :  { %937 = vmatpush3.bf16.msra.mxu1 %v1006_v59  ;;  %916 = vmatprep.subr.bf16.mxu0 %v1007_v60 }
  0x5b   :  { %938 = vmatprep.subr.bf16.mxu1 %v1008_v61 }
  0x5d   :  { %917 = vmatpush3.bf16.msra.mxu0 %v1009_v62 }
  0x5e   :  { %939 = vmatpush3.bf16.msra.mxu1 %v1010_v63  ;;  %918 = vmatprep.subr.bf16.mxu0 %v1011_v0 }
  0x5f   :  { %940 = vmatprep.subr.bf16.mxu1 %v1012_v1 }
  0x61   :  { %919 = vmatpush3.bf16.msra.mxu0 %v1013_v2 }
  0x62   :  { %941 = vmatpush3.bf16.msra.mxu1 %v1014_v3  ;;  %920 = vmatprep.subr.bf16.mxu0 %v1015_v4 }
  0x63   :  { %942 = vmatprep.subr.bf16.mxu1 %v1016_v5 }
  0x65   :  { %921 = vmatpush3.bf16.msra.mxu0 %v1017_v6 }
  0x66   :  { %943 = vmatpush3.bf16.msra.mxu1 %v1018_v7 }
  0x68   :  { %691 = vmatmul.mubr.bf16.vlgmr.msra.gmra.mrb[4].mxu0 %v62_v14 }
  0x69   :  { %731 = vmatmul.mubr.bf16.vlgmr.msra.gmra.mrb[4].mxu1 %v64_v15 }
 0x11b   :  { %v878_v16 = vpop.f32.mrb[0].mxu0 }
 0x11c   :  { %v900_v17 = vpop.f32.mrb[0].mxu1  ;;  %v879_v18 = vpop.f32.mrb[1].mxu0 }
 0x11d   :  { %v901_v19 = vpop.f32.mrb[1].mxu1  ;;  %v880_v20 = vadd.f32 %v879_v18, %v878_v16  ;;  %v881_v22 = vpop.f32.mrb[2].mxu0 }
 0x11e   :  { %v902_v21 = vadd.f32 %v901_v19, %v900_v17  ;;  %v903_v23 = vpop.f32.mrb[2].mxu1  ;;  %v882_v24 = vpop.f32.mrb[3].mxu0 }
 0x11f   :  { %v904_v25 = vpop.f32.mrb[3].mxu1 }
 0x120   :  { %v653_v26 = vadd.f32 %v902_v21, %v880_v20 }
 0x13b   :  { %v922_v28 = vpop.f32.mrb[4].mxu0 }
 0x13c   :  { %v944_v29 = vpop.f32.mrb[4].mxu1  ;;  %v923_v30 = vpop.f32.mrb[5].mxu0 }
 0x13d   :  { %v924_v31 = vadd.f32 %v923_v30, %v922_v28  ;;  %v945_v32 = vpop.f32.mrb[5].mxu1  ;;  %v925_v33 = vpop.f32.mrb[6].mxu0 }
 0x13e   :  { %v946_v34 = vadd.f32 %v945_v32, %v944_v29  ;;  %v947_v35 = vpop.f32.mrb[6].mxu1  ;;  %v926_v36 = vpop.f32.mrb[7].mxu0 }
 0x13f   :  { %v693_v38 = vadd.f32 %v924_v31, %v653_v26  ;;  %v948_v39 = vpop.f32.mrb[7].mxu1 }
 0x141   :  { %v733_v41 = vadd.f32 %v946_v34, %v693_v38 }
 0x143   :  { %v751_v42 = vadd.f32 %v861_v40, %v733_v41 }
 0x145   :  { %v756_v43 = vsel %vm755_vm0, %v751_v42, -inf  ;;  %752 = vst [vmem:[#allocation8] sm:$0xff] %v751_v42 }
 0x146   :  { %757 = vmax.xlane.f32.xlu0 %v756_v43 }
 0x1d3   :  { %v758_v44 = vpop.xlane.xlu0 %757 }
 0x1d4   :  { %vm759_vm1 = vcmp.eq.f32.partialorder %v756_v43, %v758_v44 }
 0x1d5   :  { %v760_v45 = vsel %vm759_vm1, %v754_v37, 128 }
 0x1d6   :  { %v762_v46 = vshra.s32 %v760_v45, 16  ;;  %v761_v48 = vand.u32 65535, %v760_v45 }
 0x1d8   :  { %v764_v47 = vcvt.s32.f32 %v762_v46  ;;  %v763_v50 = vcvt.s32.f32 %v761_v48 }
 0x1da   :  { %765 = vmin.xlane.f32.xlu0 %v764_v47 }
 0x267   :  { %v766_v49 = vpop.xlane.xlu0 %765 }
 0x268   :  { %vm767_vm2 = vcmp.eq.f32.partialorder %v764_v47, %v766_v49 }
 0x269   :  { %v768_v51 = vsel %vm767_vm2, %v763_v50, inf }
 0x26a   :  { %769 = vmin.xlane.f32.xlu1 %v768_v51 }
 0x26b   :  { %1074 = shalt.err (!%p1071_p6)
}
 0x26c   :  { %s1075_s19 = scalar_lea.hbm %s1173_s3, 128 }
 0x26d   :  { %p1076_p7 = scmp.ne.s32.totalorder %s1173_s3, %s1075_s19  ;;  %p1079_p8 = scmp.lt.u32.totalorder %s1075_s19, %s1173_s3 }
 0x26f   :  { %p1081_p9 = pnand %p1079_p8, %p1076_p7 }
 0x271   :  { %1084 = shalt.err (!%p1081_p9)
}
 0x272   :  { %786 = dma.vmem_to_hbm [thread:$0]  %s784_s2, 128, %s1173_s3, [#allocation5]   ;;  %v772_v52 = vcvt.f32.s32 %v766_v49  ;;  %vm775_vm3 = vcmask 7168  }
 0x274   :  { %v773_v54 = vshll.u32 %v772_v52, 16 }
 0x2f7   :  { %v770_v53 = vpop.xlane.xlu1 %769 }
 0x2f8   :  { %v771_v55 = vcvt.f32.s32 %v770_v53 }
 0x2fa   :  { %v774_v56 = vadd.s32 %v773_v54, %v771_v55 }
 0x2fc   :  { %776 = vst.msk [vmem:[%s1174_s4] sm:$0xff] %vm775_vm3, %v774_v56 }
 0x2fd   :  { %1089 = dma.done.wait [#allocation5], 128  }
 0x2fe   :  { %1090 = vsyncadd [#allocation5], 4294967168 }
 0x2ff   :  { %794 = vsyncpa [#allocation4], 1 }
 0x300   :  { %795 = vsyncpa [#allocation7], 1 }
 0x301   :  { %796 = vsyncpa [#allocation5], 1 }

</bundles_post_ra>
